<compile_context>
chip_gen: v5e
topology: v5e:2x2
jax: 0.10.0
libtpu: 0.0.40
codegen_flags: <defaults>
</compile_context>

<pallas_src>
import jax
import jax.numpy as jnp
from jax import lax
from jax.experimental import pallas as pl
from jax.experimental.pallas import tpu as pltpu

_BN_EPS = 1e-5
_LEAKY_SLOPE = 0.01


def _residual_block(x, params_ref):
    """Temporal residual block on a (TB, L) tile. Returns z of shape (TB, L-6).

    params (SMEM f32[10]): [0:3] conv1 w, [3] conv1 b, [4:7] conv2 w, [7] conv2 b,
                           [8] BN gamma, [9] BN beta (gamma/beta unused here).
    conv(k=3, dilation=2, pad=1) + chomp(1):  y[t] = w0*v[t-1] + w1*v[t+1] + w2*v[t+3] + b
    with v[-1] = 0 (left zero pad).  weight_norm is a reparameterization; effective
    weights are used directly.
    """
    TB, L = x.shape
    W = L - 6
    w10, w11, w12, b1 = params_ref[0], params_ref[1], params_ref[2], params_ref[3]
    w20, w21, w22, b2 = params_ref[4], params_ref[5], params_ref[6], params_ref[7]
    zcol = jnp.zeros((TB, 1), jnp.float32)

    # conv1 + chomp + relu, evaluated on its full valid range u in [0, L-3).
    xm1 = jnp.concatenate([zcol, x[:, : L - 4]], axis=1)   # x[u-1], x[-1] = 0
    xp1 = x[:, 1 : L - 2]                                  # x[u+1]
    xp3 = x[:, 3 : L]                                      # x[u+3]
    y1 = jnp.maximum(w10 * xm1 + w11 * xp1 + w12 * xp3 + b1, 0.0)      # (TB, L-3)

    # conv2 + chomp + relu, evaluated on t in [0, L-6).
    y1m1 = jnp.concatenate([zcol, y1[:, : W - 1]], axis=1)  # y1[t-1], y1[-1] = 0
    y1p1 = y1[:, 1 : W + 1]                                 # y1[t+1]
    y1p3 = y1[:, 3 : W + 3]                                 # y1[t+3]
    y2 = jnp.maximum(w20 * y1m1 + w21 * y1p1 + w22 * y1p3 + b2, 0.0)   # (TB, W)

    # residual add (downsample is None since n_in == n_out == 1) + relu.
    return jnp.maximum(y2 + x[:, :W], 0.0)


def _stats_kernel(params_ref, x_ref, psum_ref):
    """Pass 1: per-tile partial BN statistics (single fused pass: sum and sum-of-squares)."""
    z = _residual_block(x_ref[...], params_ref)
    s1 = jnp.sum(z)
    s2 = jnp.sum(z * z)
    row = lax.broadcasted_iota(jnp.int32, psum_ref.shape, 0)
    psum_ref[...] = jnp.where(row == 0, s1, jnp.where(row == 1, s2, 0.0))


def _norm_kernel(params_ref, affine_ref, x_ref, o_ref):
    """Pass 2: recompute conv/residual, apply BN affine + LeakyReLU, store (TB, L-6)."""
    z = _residual_block(x_ref[...], params_ref)
    t = z * affine_ref[0] + affine_ref[1]
    o_ref[...] = jnp.maximum(t, _LEAKY_SLOPE * t)


def _pick_batch_tile(B):
    # Prefer a multiple-of-8 sublane tile; otherwise take the whole (small) batch.
    for tb in (64, 32, 16, 8):
        if B % tb == 0:
            return tb
    return B


@jax.jit
def residual_forward(x_ncl, params):
    """x_ncl: (B, 1, L) float32, params: f32[10]. Returns (B, 1, L-6) float32."""
    B, C, L = x_ncl.shape
    assert C == 1, "Residual module uses single-channel Conv1d"
    assert L >= 8, "need at least 8 time steps (output length is L-6)"
    W = L - 6
    x2d = x_ncl[:, 0, :].astype(jnp.float32)

    TB = _pick_batch_tile(B)
    nb = B // TB
    cparams = pltpu.CompilerParams(
        dimension_semantics=("parallel",),       # shard batch tiles across v7x's 2 TCs
        vmem_limit_bytes=32 * 1024 * 1024,       # safe on v7x (64 MiB physical VMEM)
    )

    # Pass 1: per-tile partial sums (s1, s2) of z.
    psums = pl.pallas_call(
        _stats_kernel,
        out_shape=jax.ShapeDtypeStruct((nb * 8, 128), jnp.float32),
        grid=(nb,),
        in_specs=[
            pl.BlockSpec(memory_space=pltpu.MemorySpace.SMEM),      # params
            pl.BlockSpec((TB, L), lambda i: (i, 0)),                # x tile
        ],
        out_specs=pl.BlockSpec((8, 128), lambda i: (i, 0)),
        compiler_params=cparams,
    )(params, x2d)

    # Tiny host-side (XLA) reduction + BN affine coefficients.
    n = jnp.float32(B * W)
    s1 = jnp.sum(psums[0::8, 0])
    s2 = jnp.sum(psums[1::8, 0])
    mean = s1 / n
    var = jnp.maximum(s2 / n - mean * mean, 0.0)   # biased var (BN train mode)
    gamma, beta = params[8], params[9]
    scale = gamma / jnp.sqrt(var + _BN_EPS)
    shift = beta - mean * scale
    affine = jnp.stack([scale, shift]).astype(jnp.float32)

    # Pass 2: normalize + LeakyReLU, writing the (B, L-6) result directly.
    out2d = pl.pallas_call(
        _norm_kernel,
        out_shape=jax.ShapeDtypeStruct((B, W), jnp.float32),
        grid=(nb,),
        in_specs=[
            pl.BlockSpec(memory_space=pltpu.MemorySpace.SMEM),      # params
            pl.BlockSpec(memory_space=pltpu.MemorySpace.SMEM),      # [scale, shift]
            pl.BlockSpec((TB, L), lambda i: (i, 0)),                # x tile
        ],
        out_specs=pl.BlockSpec((TB, W), lambda i: (i, 0)),
        compiler_params=cparams,
    )(params, affine, x2d)

    return out2d[:, None, :]                       # free reshape, no slice copy


def _reference_forward(x_ncl, params):
    """Pure-JAX reference matching the PyTorch forward (dropout = identity)."""
    w1, b1 = params[0:3], params[3]
    w2, b2 = params[4:7], params[7]
    gamma, beta = params[8], params[9]
    v = x_ncl[:, 0, :].astype(jnp.float32)

    def dconv(u, w, b):
        Lin = u.shape[-1]
        up = jnp.pad(u, ((0, 0), (1, 1)))
        Lout = Lin - 2  # L + 2*pad - dilation*(k-1) with pad=1, dilation=2, k=3
        return b + sum(w[k] * up[:, 2 * k: 2 * k + Lout] for k in range(3))

    y1 = jax.nn.relu(dconv(v, w1, b1)[:, :-1])   # chomp(1)
    y2 = jax.nn.relu(dconv(y1, w2, b2)[:, :-1])  # chomp(1)
    W = y2.shape[-1]
    z = jax.nn.relu(y2 + v[:, :W])
    mean = jnp.mean(z)
    var = jnp.mean((z - mean) ** 2)
    zn = (z - mean) / jnp.sqrt(var + _BN_EPS) * gamma + beta
    out = jnp.where(zn >= 0.0, zn, _LEAKY_SLOPE * zn)
    return out[:, None, :]


if __name__ == "__main__":
    key = jax.random.PRNGKey(0)
    k_x, k_w1, k_b1, k_w2, k_b2 = jax.random.split(key, 5)

    B, C, L = 2, 1, 128
    x = jax.random.normal(k_x, (B, C, L), dtype=jnp.float32)

    # conv weights ~ N(0, 0.01) like init_weights; weight_norm is a reparameterization,
    # so effective weights are used directly.  BatchNorm affine defaults: gamma=1, beta=0.
    w1 = 0.01 * jax.random.normal(k_w1, (3,), dtype=jnp.float32)
    b1 = 0.01 * jax.random.normal(k_b1, (1,), dtype=jnp.float32)
    w2 = 0.01 * jax.random.normal(k_w2, (3,), dtype=jnp.float32)
    b2 = 0.01 * jax.random.normal(k_b2, (1,), dtype=jnp.float32)
    gamma = jnp.ones((1,), jnp.float32)
    beta = jnp.zeros((1,), jnp.float32)
    params = jnp.concatenate([w1, b1, w2, b2, gamma, beta]).astype(jnp.float32)

    out = jax.block_until_ready(residual_forward(x, params))
    ref = _reference_forward(x, params)

    assert out.shape == (B, 1, L - 6), out.shape
    max_err = float(jnp.max(jnp.abs(out - ref)))
    assert max_err < 1e-4, max_err
    print("KERNEL_OK")
</pallas_src>

<mosaic_0001>
module attributes {stable_mosaic.version = 11 : i64} {
  func.func @_stats_kernel(%arg0: i32, %arg1: memref<10xf32, #tpu.memory_space<smem>>, %arg2: memref<2x128xf32, #tpu.memory_space<vmem>>, %arg3: memref<8x128xf32, #tpu.memory_space<vmem>>) attributes {dimension_semantics = [#tpu.dimension_semantics<parallel>], iteration_bounds = array<i64: 1>, scalar_prefetch = 0 : i64, scratch_operands = 0 : i64, tpu.core_type = #tpu.core_type<tc>, window_params = [{transform_indices = @transform_0, window_bounds = array<i64: 10>}, {transform_indices = @transform_1, window_bounds = array<i64: 2, 128>}, {transform_indices = @transform_2, window_bounds = array<i64: 8, 128>}]} {
    %c0 = arith.constant 0 : index
    %c0_0 = arith.constant 0 : index
    %0 = vector.load %arg2[%c0, %c0_0] : memref<2x128xf32, #tpu.memory_space<vmem>>, vector<2x128xf32>
    %c0_1 = arith.constant 0 : index
    %1 = memref.load %arg1[%c0_1] : memref<10xf32, #tpu.memory_space<smem>>
    %c1 = arith.constant 1 : index
    %2 = memref.load %arg1[%c1] : memref<10xf32, #tpu.memory_space<smem>>
    %c2 = arith.constant 2 : index
    %3 = memref.load %arg1[%c2] : memref<10xf32, #tpu.memory_space<smem>>
    %c3 = arith.constant 3 : index
    %4 = memref.load %arg1[%c3] : memref<10xf32, #tpu.memory_space<smem>>
    %c4 = arith.constant 4 : index
    %5 = memref.load %arg1[%c4] : memref<10xf32, #tpu.memory_space<smem>>
    %c5 = arith.constant 5 : index
    %6 = memref.load %arg1[%c5] : memref<10xf32, #tpu.memory_space<smem>>
    %c6 = arith.constant 6 : index
    %7 = memref.load %arg1[%c6] : memref<10xf32, #tpu.memory_space<smem>>
    %c7 = arith.constant 7 : index
    %8 = memref.load %arg1[%c7] : memref<10xf32, #tpu.memory_space<smem>>
    %cst = arith.constant 0.000000e+00 : f32
    %9 = vector.broadcast %cst : f32 to vector<2x1xf32>
    %10 = vector.extract_strided_slice %0 {offsets = [0, 0], sizes = [2, 124], strides = [1, 1]} : vector<2x128xf32> to vector<2x124xf32>
    %11 = tpu.concatenate %9, %10 in 1 : vector<2x1xf32>, vector<2x124xf32> -> vector<2x125xf32>
    %12 = vector.extract_strided_slice %0 {offsets = [0, 1], sizes = [2, 125], strides = [1, 1]} : vector<2x128xf32> to vector<2x125xf32>
    %13 = vector.extract_strided_slice %0 {offsets = [0, 3], sizes = [2, 125], strides = [1, 1]} : vector<2x128xf32> to vector<2x125xf32>
    %14 = vector.broadcast %1 : f32 to vector<2x125xf32>
    %15 = arith.mulf %14, %11 : vector<2x125xf32>
    %16 = vector.broadcast %2 : f32 to vector<2x125xf32>
    %17 = arith.mulf %16, %12 : vector<2x125xf32>
    %18 = arith.addf %15, %17 : vector<2x125xf32>
    %19 = vector.broadcast %3 : f32 to vector<2x125xf32>
    %20 = arith.mulf %19, %13 : vector<2x125xf32>
    %21 = arith.addf %18, %20 : vector<2x125xf32>
    %22 = vector.broadcast %4 : f32 to vector<2x125xf32>
    %23 = arith.addf %21, %22 : vector<2x125xf32>
    %cst_2 = arith.constant 0.000000e+00 : f32
    %24 = vector.broadcast %cst_2 : f32 to vector<2x125xf32>
    %25 = arith.maximumf %23, %24 : vector<2x125xf32>
    %26 = vector.extract_strided_slice %25 {offsets = [0, 0], sizes = [2, 121], strides = [1, 1]} : vector<2x125xf32> to vector<2x121xf32>
    %27 = tpu.concatenate %9, %26 in 1 : vector<2x1xf32>, vector<2x121xf32> -> vector<2x122xf32>
    %28 = vector.extract_strided_slice %25 {offsets = [0, 1], sizes = [2, 122], strides = [1, 1]} : vector<2x125xf32> to vector<2x122xf32>
    %29 = vector.extract_strided_slice %25 {offsets = [0, 3], sizes = [2, 122], strides = [1, 1]} : vector<2x125xf32> to vector<2x122xf32>
    %30 = vector.broadcast %5 : f32 to vector<2x122xf32>
    %31 = arith.mulf %30, %27 : vector<2x122xf32>
    %32 = vector.broadcast %6 : f32 to vector<2x122xf32>
    %33 = arith.mulf %32, %28 : vector<2x122xf32>
    %34 = arith.addf %31, %33 : vector<2x122xf32>
    %35 = vector.broadcast %7 : f32 to vector<2x122xf32>
    %36 = arith.mulf %35, %29 : vector<2x122xf32>
    %37 = arith.addf %34, %36 : vector<2x122xf32>
    %38 = vector.broadcast %8 : f32 to vector<2x122xf32>
    %39 = arith.addf %37, %38 : vector<2x122xf32>
    %cst_3 = arith.constant 0.000000e+00 : f32
    %40 = vector.broadcast %cst_3 : f32 to vector<2x122xf32>
    %41 = arith.maximumf %39, %40 : vector<2x122xf32>
    %42 = vector.extract_strided_slice %0 {offsets = [0, 0], sizes = [2, 122], strides = [1, 1]} : vector<2x128xf32> to vector<2x122xf32>
    %43 = arith.addf %41, %42 : vector<2x122xf32>
    %cst_4 = arith.constant 0.000000e+00 : f32
    %44 = vector.broadcast %cst_4 : f32 to vector<2x122xf32>
    %45 = arith.maximumf %43, %44 : vector<2x122xf32>
    %46 = vector.shape_cast %45 : vector<2x122xf32> to vector<1x2x122xf32>
    %cst_5 = arith.constant dense<0.000000e+00> : vector<1xf32>
    %47 = vector.multi_reduction <add>, %46, %cst_5 [1, 2] : vector<1x2x122xf32> to vector<1xf32>
    %48 = vector.shape_cast %47 : vector<1xf32> to vector<1x1x1xf32>
    %49 = vector.extract %48[0, 0, 0] : f32 from vector<1x1x1xf32>
    %50 = arith.mulf %45, %45 : vector<2x122xf32>
    %51 = vector.shape_cast %50 : vector<2x122xf32> to vector<1x2x122xf32>
    %cst_6 = arith.constant dense<0.000000e+00> : vector<1xf32>
    %52 = vector.multi_reduction <add>, %51, %cst_6 [1, 2] : vector<1x2x122xf32> to vector<1xf32>
    %53 = vector.shape_cast %52 : vector<1xf32> to vector<1x1x1xf32>
    %54 = vector.extract %53[0, 0, 0] : f32 from vector<1x1x1xf32>
    %55 = tpu.iota {dimensions = array<i32: 0>} : vector<8x128xi32>
    %c0_i32 = arith.constant 0 : i32
    %56 = vector.broadcast %c0_i32 : i32 to vector<8x128xi32>
    %57 = arith.cmpi eq, %55, %56 : vector<8x128xi32>
    %c1_i32 = arith.constant 1 : i32
    %58 = vector.broadcast %c1_i32 : i32 to vector<8x128xi32>
    %59 = arith.cmpi eq, %55, %58 : vector<8x128xi32>
    %cst_7 = arith.constant 0.000000e+00 : f32
    %60 = vector.broadcast %54 : f32 to vector<8x128xf32>
    %61 = vector.broadcast %cst_7 : f32 to vector<8x128xf32>
    %62 = arith.select %59, %60, %61 : vector<8x128xi1>, vector<8x128xf32>
    %63 = vector.broadcast %49 : f32 to vector<8x128xf32>
    %64 = arith.select %57, %63, %62 : vector<8x128xi1>, vector<8x128xf32>
    %c0_8 = arith.constant 0 : index
    %c0_9 = arith.constant 0 : index
    %65 = vector.load %arg3[%c0_8, %c0_9] : memref<8x128xf32, #tpu.memory_space<vmem>>, vector<8x128xf32>
    tpu.vector_store %arg3[%c0_8, %c0_9], %64 {strides = array<i32>} : memref<8x128xf32, #tpu.memory_space<vmem>>, vector<8x128xf32>,
    return
  }
  func.func @transform_0(%arg0: i32) -> i32 {
    %c0_i32 = arith.constant 0 : i32
    %c0_i32_0 = arith.constant 0 : i32
    return %c0_i32 : i32
  }
  func.func @transform_1(%arg0: i32) -> (i32, i32) {
    %c0_i32 = arith.constant 0 : i32
    %c0_i32_0 = arith.constant 0 : i32
    return %arg0, %c0_i32 : i32, i32
  }
  func.func @transform_2(%arg0: i32) -> (i32, i32) {
    %c0_i32 = arith.constant 0 : i32
    %c0_i32_0 = arith.constant 0 : i32
    return %arg0, %c0_i32 : i32, i32
  }
}

module attributes {stable_mosaic.version = 11 : i64} {
  func.func @_norm_kernel(%arg0: i32, %arg1: memref<10xf32, #tpu.memory_space<smem>>, %arg2: memref<2xf32, #tpu.memory_space<smem>>, %arg3: memref<2x128xf32, #tpu.memory_space<vmem>>, %arg4: memref<2x122xf32, #tpu.memory_space<vmem>>) attributes {dimension_semantics = [#tpu.dimension_semantics<parallel>], iteration_bounds = array<i64: 1>, scalar_prefetch = 0 : i64, scratch_operands = 0 : i64, tpu.core_type = #tpu.core_type<tc>, window_params = [{transform_indices = @transform_0, window_bounds = array<i64: 10>}, {transform_indices = @transform_1, window_bounds = array<i64: 2>}, {transform_indices = @transform_2, window_bounds = array<i64: 2, 128>}, {transform_indices = @transform_3, window_bounds = array<i64: 2, 122>}]} {
    %c0 = arith.constant 0 : index
    %c0_0 = arith.constant 0 : index
    %0 = vector.load %arg3[%c0, %c0_0] : memref<2x128xf32, #tpu.memory_space<vmem>>, vector<2x128xf32>
    %c0_1 = arith.constant 0 : index
    %1 = memref.load %arg1[%c0_1] : memref<10xf32, #tpu.memory_space<smem>>
    %c1 = arith.constant 1 : index
    %2 = memref.load %arg1[%c1] : memref<10xf32, #tpu.memory_space<smem>>
    %c2 = arith.constant 2 : index
    %3 = memref.load %arg1[%c2] : memref<10xf32, #tpu.memory_space<smem>>
    %c3 = arith.constant 3 : index
    %4 = memref.load %arg1[%c3] : memref<10xf32, #tpu.memory_space<smem>>
    %c4 = arith.constant 4 : index
    %5 = memref.load %arg1[%c4] : memref<10xf32, #tpu.memory_space<smem>>
    %c5 = arith.constant 5 : index
    %6 = memref.load %arg1[%c5] : memref<10xf32, #tpu.memory_space<smem>>
    %c6 = arith.constant 6 : index
    %7 = memref.load %arg1[%c6] : memref<10xf32, #tpu.memory_space<smem>>
    %c7 = arith.constant 7 : index
    %8 = memref.load %arg1[%c7] : memref<10xf32, #tpu.memory_space<smem>>
    %cst = arith.constant 0.000000e+00 : f32
    %9 = vector.broadcast %cst : f32 to vector<2x1xf32>
    %10 = vector.extract_strided_slice %0 {offsets = [0, 0], sizes = [2, 124], strides = [1, 1]} : vector<2x128xf32> to vector<2x124xf32>
    %11 = tpu.concatenate %9, %10 in 1 : vector<2x1xf32>, vector<2x124xf32> -> vector<2x125xf32>
    %12 = vector.extract_strided_slice %0 {offsets = [0, 1], sizes = [2, 125], strides = [1, 1]} : vector<2x128xf32> to vector<2x125xf32>
    %13 = vector.extract_strided_slice %0 {offsets = [0, 3], sizes = [2, 125], strides = [1, 1]} : vector<2x128xf32> to vector<2x125xf32>
    %14 = vector.broadcast %1 : f32 to vector<2x125xf32>
    %15 = arith.mulf %14, %11 : vector<2x125xf32>
    %16 = vector.broadcast %2 : f32 to vector<2x125xf32>
    %17 = arith.mulf %16, %12 : vector<2x125xf32>
    %18 = arith.addf %15, %17 : vector<2x125xf32>
    %19 = vector.broadcast %3 : f32 to vector<2x125xf32>
    %20 = arith.mulf %19, %13 : vector<2x125xf32>
    %21 = arith.addf %18, %20 : vector<2x125xf32>
    %22 = vector.broadcast %4 : f32 to vector<2x125xf32>
    %23 = arith.addf %21, %22 : vector<2x125xf32>
    %cst_2 = arith.constant 0.000000e+00 : f32
    %24 = vector.broadcast %cst_2 : f32 to vector<2x125xf32>
    %25 = arith.maximumf %23, %24 : vector<2x125xf32>
    %26 = vector.extract_strided_slice %25 {offsets = [0, 0], sizes = [2, 121], strides = [1, 1]} : vector<2x125xf32> to vector<2x121xf32>
    %27 = tpu.concatenate %9, %26 in 1 : vector<2x1xf32>, vector<2x121xf32> -> vector<2x122xf32>
    %28 = vector.extract_strided_slice %25 {offsets = [0, 1], sizes = [2, 122], strides = [1, 1]} : vector<2x125xf32> to vector<2x122xf32>
    %29 = vector.extract_strided_slice %25 {offsets = [0, 3], sizes = [2, 122], strides = [1, 1]} : vector<2x125xf32> to vector<2x122xf32>
    %30 = vector.broadcast %5 : f32 to vector<2x122xf32>
    %31 = arith.mulf %30, %27 : vector<2x122xf32>
    %32 = vector.broadcast %6 : f32 to vector<2x122xf32>
    %33 = arith.mulf %32, %28 : vector<2x122xf32>
    %34 = arith.addf %31, %33 : vector<2x122xf32>
    %35 = vector.broadcast %7 : f32 to vector<2x122xf32>
    %36 = arith.mulf %35, %29 : vector<2x122xf32>
    %37 = arith.addf %34, %36 : vector<2x122xf32>
    %38 = vector.broadcast %8 : f32 to vector<2x122xf32>
    %39 = arith.addf %37, %38 : vector<2x122xf32>
    %cst_3 = arith.constant 0.000000e+00 : f32
    %40 = vector.broadcast %cst_3 : f32 to vector<2x122xf32>
    %41 = arith.maximumf %39, %40 : vector<2x122xf32>
    %42 = vector.extract_strided_slice %0 {offsets = [0, 0], sizes = [2, 122], strides = [1, 1]} : vector<2x128xf32> to vector<2x122xf32>
    %43 = arith.addf %41, %42 : vector<2x122xf32>
    %cst_4 = arith.constant 0.000000e+00 : f32
    %44 = vector.broadcast %cst_4 : f32 to vector<2x122xf32>
    %45 = arith.maximumf %43, %44 : vector<2x122xf32>
    %c0_5 = arith.constant 0 : index
    %46 = memref.load %arg2[%c0_5] : memref<2xf32, #tpu.memory_space<smem>>
    %47 = vector.broadcast %46 : f32 to vector<2x122xf32>
    %48 = arith.mulf %45, %47 : vector<2x122xf32>
    %c1_6 = arith.constant 1 : index
    %49 = memref.load %arg2[%c1_6] : memref<2xf32, #tpu.memory_space<smem>>
    %50 = vector.broadcast %49 : f32 to vector<2x122xf32>
    %51 = arith.addf %48, %50 : vector<2x122xf32>
    %cst_7 = arith.constant 0.00999999977 : f32
    %52 = vector.broadcast %cst_7 : f32 to vector<2x122xf32>
    %53 = arith.mulf %52, %51 : vector<2x122xf32>
    %54 = arith.maximumf %51, %53 : vector<2x122xf32>
    %c0_8 = arith.constant 0 : index
    %c0_9 = arith.constant 0 : index
    %55 = vector.load %arg4[%c0_8, %c0_9] : memref<2x122xf32, #tpu.memory_space<vmem>>, vector<2x122xf32>
    tpu.vector_store %arg4[%c0_8, %c0_9], %54 {strides = array<i32>} : memref<2x122xf32, #tpu.memory_space<vmem>>, vector<2x122xf32>,
    return
  }
  func.func @transform_0(%arg0: i32) -> i32 {
    %c0_i32 = arith.constant 0 : i32
    %c0_i32_0 = arith.constant 0 : i32
    return %c0_i32 : i32
  }
  func.func @transform_1(%arg0: i32) -> i32 {
    %c0_i32 = arith.constant 0 : i32
    %c0_i32_0 = arith.constant 0 : i32
    return %c0_i32 : i32
  }
  func.func @transform_2(%arg0: i32) -> (i32, i32) {
    %c0_i32 = arith.constant 0 : i32
    %c0_i32_0 = arith.constant 0 : i32
    return %arg0, %c0_i32 : i32, i32
  }
  func.func @transform_3(%arg0: i32) -> (i32, i32) {
    %c0_i32 = arith.constant 0 : i32
    %c0_i32_0 = arith.constant 0 : i32
    return %arg0, %c0_i32 : i32, i32
  }
}

</mosaic_0001>

<bundles_post_ra>
// kernel: residual_forward.3
= control target key start
LH: loop header
LB: loop body
LE: loop exit
PB: predicated region body
PF: predicated region fallthrough
CT: control target
= control target key end

     0   :  { %8 = vsyncpa [#allocation4], 0  ;;  %s236_s0 = inlined_call_operand.vmem [shape: f32[10], index: 0, kind: input, shape index: {}]   ;;  %s237_s1 = inlined_call_operand.vmem [shape: f32[2], index: 1, kind: input, shape index: {}]   ;;  %s238_s2 = inlined_call_operand.vmem [shape: f32[2,128], index: 2, kind: input, shape index: {}]   ;;  %s239_s3 = inlined_call_operand.hbm [shape: f32[2,122], index: 3, kind: output, shape index: {}]  }
   0x1   :  { %9 = vsyncpa [#allocation6], 0 }
   0x2   :  { %10 = vsyncpa [#allocation3], 0  ;;  %s16_s14 = sshll.u32 %s236_s0, 4  ;;  %s25_s17 = sshll.u32 %s237_s1, 4  ;;  %s17_s14 = int_to_ptr.vmem [resolvable:$true] %s16_s14  ;;  %s26_s17 = int_to_ptr.vmem [resolvable:$true] %s25_s17 }
   0x3   :  { %s196_s18 = smov [#allocation2]   ;;  %s197_s19 = smov [#allocation5]  }
   0x4   :  { %19 = dma.vmem_to_smem %s17_s14, 16, %s196_s18, [#allocation4]  }
   0x5   :  { %28 = dma.vmem_to_smem %s26_s17, 16, %s197_s19, [#allocation6]  }
   0x6   :  { %190 = dma.done.wait [#allocation4], 16  }
   0x7   :  { %191 = vsyncadd [#allocation4], 4294967280 }
   0x8   :  { %192 = dma.done.wait [#allocation6], 16  }
   0x9   :  { %193 = vsyncadd [#allocation6], 4294967280 }
   0xa   :  { %39 = sfence }
   0xb   :  { %v40_v0 = vld [vmem:[%s238_s2] sm:$0x3]  ;;  %s128_s0 = sld [smem:[#allocation2 + $0x1]]  ;;  %s198_s22 = smov 1   ;;  %vm53_vm0 = vcmask 7168   ;;  %vm108_vm1 = vcmask 992256  }
   0xc   :  { %50 = vrot.lane.b32.xlu0 %v40_v0, %s198_s22  ;;  %s129_s23 = sld [smem:[#allocation2 + $0x2]]  ;;  %s199_s1 = smov 127  }
   0xd   :  { %s200_s24 = smov 125   ;;  %s41_s25 = sld [smem:[#allocation2]] }
   0xe   :  { %s130_s26 = sld [smem:[#allocation2 + $0x3]]  ;;  %s201_s5 = smov [#allocation7]  }
   0xf   :  { %s132_s2 = sld [smem:[#allocation2 + $0x5]]  ;;  %s115_s6 = sshll.u32 %s201_s5, 4  ;;  %s116_s6 = int_to_ptr.vmem [resolvable:$true] %s115_s6 }
  0x10   :  { %s133_s27 = sld [smem:[#allocation2 + $0x6]]  ;;  %s117_s9 = sshll.u32 %s239_s3, 4  ;;  %s118_s9 = int_to_ptr.hbm [resolvable:$true] %s117_s9 }
  0x11   :  { %v57_v1 = vstv %s128_s0  ;;  %s131_s28 = sld [smem:[#allocation2 + $0x4]] }
  0x12   :  { %v58_v2 = vmul.f32 %v57_v1, %v40_v0  ;;  %v64_v3 = vstv %s129_s23  ;;  %s134_s29 = sld [smem:[#allocation2 + $0x7]] }
  0x13   :  { %v65_v4 = vmul.f32 %v64_v3, %v40_v0  ;;  %v55_v6 = vstv %s41_s25  ;;  %s100_s30 = sld [smem:[#allocation5]] }
  0x14   :  { %60 = vrot.lane.b32.xlu0 %v58_v2, %s199_s1  ;;  %v71_v12 = vstv %s130_s26  ;;  %s135_s4 = sld [smem:[#allocation5 + $0x1]] }
  0x15   :  { %67 = vrot.lane.b32.xlu1 %v65_v4, %s200_s24  ;;  %v81_v15 = vstv %s132_s2 }
  0x16   :  { %v88_v18 = vstv %s133_s27 }
  0x17   :  { %v79_v21 = vstv %s131_s28 }
  0x18   :  { %v95_v27 = vstv %s134_s29 }
  0x19   :  { %v101_v32 = vstv %s100_s30 }
  0x1a   :  { %v104_v34 = vstv %s135_s4 }
  0x7e   :  { %v51_v5 = vpop.permute.xlu0 %50 }
  0x7f   :  { %v54_v7 = vsel %vm53_vm0, 0.0, %v51_v5 }
  0x80   :  { %v56_v8 = vmul.f32 %v55_v6, %v54_v7 }
  0x86   :  { %v61_v9 = vpop.permute.xlu0 %60 }
  0x87   :  { %v63_v10 = vadd.f32 %v61_v9, %v56_v8  ;;  %v68_v11 = vpop.permute.xlu1 %67 }
  0x89   :  { %v70_v13 = vadd.f32 %v68_v11, %v63_v10 }
  0x8b   :  { %v72_v14 = vadd.f32 %v71_v12, %v70_v13 }
  0x8d   :  { %v73_v16 = vmax.f32 %v72_v14, 0.0 }
  0x8f   :  { %75 = vrot.lane.b32.xlu1 %v73_v16, %s198_s22  ;;  %v82_v17 = vmul.f32 %v81_v15, %v73_v16  ;;  %v89_v19 = vmul.f32 %v88_v18, %v73_v16 }
  0x91   :  { %84 = vrot.lane.b32.xlu2 %v82_v17, %s199_s1 }
  0x99   :  { %91 = vrot.lane.b32.xlu2 %v89_v19, %s200_s24 }
  0xeb   :  { %v85_v20 = vpop.permute.xlu2 %84 }
  0xf3   :  { %v92_v26 = vpop.permute.xlu2 %91 }
 0x101   :  { %v76_v22 = vpop.permute.xlu1 %75 }
 0x102   :  { %v78_v23 = vsel %vm53_vm0, 0.0, %v76_v22 }
 0x103   :  { %v80_v24 = vmul.f32 %v79_v21, %v78_v23 }
 0x105   :  { %v87_v25 = vadd.f32 %v85_v20, %v80_v24 }
 0x107   :  { %v94_v28 = vadd.f32 %v92_v26, %v87_v25 }
 0x109   :  { %v96_v29 = vadd.f32 %v95_v27, %v94_v28 }
 0x10b   :  { %v97_v30 = vmax.f32 %v96_v29, 0.0 }
 0x10d   :  { %v98_v31 = vadd.f32 %v97_v30, %v40_v0 }
 0x10f   :  { %v99_v33 = vmax.f32 %v98_v31, 0.0 }
 0x111   :  { %v102_v35 = vmul.f32 %v101_v32, %v99_v33 }
 0x113   :  { %v105_v36 = vadd.f32 %v104_v34, %v102_v35 }
 0x115   :  { %v106_v37 = vmul.f32 0.01, %v105_v36 }
 0x117   :  { %v107_v38 = vmax.f32 %v105_v36, %v106_v37 }
 0x119   :  { %109 = vst.msk [vmem:[#allocation7] sm:$0x3] %vm108_vm1, %v107_v38 }
 0x11a   :  { %120 = dma.vmem_to_hbm [thread:$0]  %s116_s6, 32, %s118_s9, [#allocation3]  }
 0x11b   :  { %194 = dma.done.wait [#allocation3], 32  }
 0x11c   :  { %195 = vsyncadd [#allocation3], 4294967264 }
 0x11d   :  { %125 = vsyncpa [#allocation3], 1 }
 0x11e   :  { %126 = vsyncpa [#allocation4], 1 }
 0x11f   :  { %127 = vsyncpa [#allocation6], 1 }

// kernel: residual_forward.2
= control target key start
LH: loop header
LB: loop body
LE: loop exit
PB: predicated region body
PF: predicated region fallthrough
CT: control target
= control target key end

     0   :  { %7 = vsyncpa [#allocation4], 0  ;;  %s222_s0 = inlined_call_operand.hbm [shape: f32[10], index: 0, kind: input, shape index: {}]   ;;  %s223_s1 = inlined_call_operand.hbm [shape: f32[2,128], index: 1, kind: input, shape index: {}]   ;;  %s224_s2 = inlined_call_operand.vmem [shape: f32[8,128], index: 2, kind: output, shape index: {}]  }
   0x1   :  { %s14_s11 = sshll.u32 %s222_s0, 4  ;;  %s15_s11 = int_to_ptr.hbm [resolvable:$true] %s14_s11 }
   0x2   :  { %8 = vsyncpa [#allocation3], 0  ;;  %s23_s14 = sshll.u32 %s223_s1, 4  ;;  %s191_s15 = smov [#allocation2]   ;;  %s24_s14 = int_to_ptr.hbm [resolvable:$true] %s23_s14 }
   0x3   :  { %17 = dma.hbm_to_smem %s15_s11, 16, %s191_s15, [#allocation4]  }
   0x4   :  { %s192_s16 = smov [#allocation5]  }
   0x5   :  { %s25_s17 = sshll.u32 %s192_s16, 4  ;;  %s26_s17 = int_to_ptr.vmem [resolvable:$true] %s25_s17 }
   0x6   :  { %28 = dma.hbm_to_vmem [thread:$0]  %s24_s14, 32, %s26_s17, [#allocation3]  }
   0x7   :  { %187 = dma.done.wait [#allocation4], 16  }
   0x8   :  { %188 = vsyncadd [#allocation4], 4294967280 }
   0x9   :  { %189 = dma.done.wait [#allocation3], 32  }
   0xa   :  { %190 = vsyncadd [#allocation3], 4294967264 }
   0xb   :  { %37 = sfence }
   0xc   :  { %v38_v0 = vld [vmem:[#allocation5] sm:$0x3]  ;;  %s135_s0 = sld [smem:[#allocation2 + $0x1]]  ;;  %s193_s18 = smov 1   ;;  %vm51_vm0 = vcmask 7168   ;;  %vm98_vm1 = vcmask 992256   ;;  %v120_v50 = vlaneseq }
   0xd   :  { %48 = vrot.lane.b32.xlu0 %v38_v0, %s193_s18  ;;  %s136_s19 = sld [smem:[#allocation2 + $0x2]]  ;;  %s194_s1 = smov 127  }
   0xe   :  { %s195_s20 = smov 125   ;;  %s39_s21 = sld [smem:[#allocation2]]  ;;  %v121_v51 = vshrl.u32 %v120_v50, 7 }
   0xf   :  { %s137_s22 = sld [smem:[#allocation2 + $0x3]] }
  0x10   :  { %s139_s23 = sld [smem:[#allocation2 + $0x5]]  ;;  %vm123_vm2 = vcmp.eq.s32.totalorder %v121_v51, 1  ;;  %vm122_vm3 = vcmp.eq.s32.totalorder %v121_v51, 0 }
  0x11   :  { %s140_s24 = sld [smem:[#allocation2 + $0x6]] }
  0x12   :  { %v55_v1 = vstv %s135_s0  ;;  %s138_s25 = sld [smem:[#allocation2 + $0x4]] }
  0x13   :  { %v56_v2 = vmul.f32 %v55_v1, %v38_v0  ;;  %v62_v3 = vstv %s136_s19  ;;  %s141_s26 = sld [smem:[#allocation2 + $0x7]] }
  0x14   :  { %v63_v4 = vmul.f32 %v62_v3, %v38_v0  ;;  %v53_v6 = vstv %s39_s21 }
  0x15   :  { %58 = vrot.lane.b32.xlu0 %v56_v2, %s194_s1  ;;  %v69_v12 = vstv %s137_s22 }
  0x16   :  { %65 = vrot.lane.b32.xlu1 %v63_v4, %s195_s20  ;;  %v79_v15 = vstv %s139_s23 }
  0x17   :  { %v86_v18 = vstv %s140_s24 }
  0x18   :  { %v77_v21 = vstv %s138_s25 }
  0x19   :  { %v93_v27 = vstv %s141_s26 }
  0x7f   :  { %v49_v5 = vpop.permute.xlu0 %48 }
  0x80   :  { %v52_v7 = vsel %vm51_vm0, 0.0, %v49_v5 }
  0x81   :  { %v54_v8 = vmul.f32 %v53_v6, %v52_v7 }
  0x87   :  { %v59_v9 = vpop.permute.xlu0 %58 }
  0x88   :  { %v61_v10 = vadd.f32 %v59_v9, %v54_v8  ;;  %v66_v11 = vpop.permute.xlu1 %65 }
  0x8a   :  { %v68_v13 = vadd.f32 %v66_v11, %v61_v10 }
  0x8c   :  { %v70_v14 = vadd.f32 %v69_v12, %v68_v13 }
  0x8e   :  { %v71_v16 = vmax.f32 %v70_v14, 0.0 }
  0x90   :  { %73 = vrot.lane.b32.xlu1 %v71_v16, %s193_s18  ;;  %v80_v17 = vmul.f32 %v79_v15, %v71_v16  ;;  %v87_v19 = vmul.f32 %v86_v18, %v71_v16 }
  0x92   :  { %82 = vrot.lane.b32.xlu2 %v80_v17, %s194_s1 }
  0x9a   :  { %89 = vrot.lane.b32.xlu2 %v87_v19, %s195_s20 }
  0xec   :  { %v83_v20 = vpop.permute.xlu2 %82 }
  0xf4   :  { %v90_v26 = vpop.permute.xlu2 %89 }
 0x102   :  { %v74_v22 = vpop.permute.xlu1 %73 }
 0x103   :  { %v76_v23 = vsel %vm51_vm0, 0.0, %v74_v22 }
 0x104   :  { %v78_v24 = vmul.f32 %v77_v21, %v76_v23 }
 0x106   :  { %v85_v25 = vadd.f32 %v83_v20, %v78_v24 }
 0x108   :  { %v92_v28 = vadd.f32 %v90_v26, %v85_v25 }
 0x10a   :  { %v94_v29 = vadd.f32 %v93_v27, %v92_v28 }
 0x10c   :  { %v95_v30 = vmax.f32 %v94_v29, 0.0 }
 0x10e   :  { %v96_v31 = vadd.f32 %v95_v30, %v38_v0 }
 0x110   :  { %v97_v32 = vmax.f32 %v96_v31, 0.0 }
 0x112   :  { %v99_v33 = vsel %vm98_vm1, %v97_v32, 0.0  ;;  %v109_v34 = vmul.f32 %v97_v32, %v97_v32 }
 0x113   :  { %100 = vadd.xlane.f32.xlu0 %v99_v33 }
 0x114   :  { %v110_v35 = vsel %vm98_vm1, %v109_v34, 0.0 }
 0x115   :  { %111 = vadd.xlane.f32.xlu1 %v110_v35 }
 0x186   :  { %v101_v36 = vpop.xlane.xlu0 %100 }
 0x187   :  { %v102_v37 = vrot.slane %v101_v36, 4 }
 0x188   :  { %v112_v38 = vpop.xlane.xlu1 %111 }
 0x189   :  { %v103_v39 = vadd.f32 %v102_v37, %v101_v36  ;;  %v113_v40 = vrot.slane %v112_v38, 4 }
 0x18b   :  { %v104_v41 = vrot.slane %v103_v39, 2  ;;  %v114_v42 = vadd.f32 %v113_v40, %v112_v38 }
 0x18d   :  { %v115_v43 = vrot.slane %v114_v42, 2  ;;  %v105_v44 = vadd.f32 %v104_v41, %v103_v39 }
 0x18f   :  { %v116_v45 = vadd.f32 %v115_v43, %v114_v42  ;;  %v106_v46 = vrot.slane %v105_v44, 1 }
 0x191   :  { %v107_v47 = vadd.f32 %v106_v46, %v105_v44  ;;  %v117_v48 = vrot.slane %v116_v45, 1 }
 0x193   :  { %142 = vpush %v107_v47  ;;  %v118_v49 = vadd.f32 %v117_v48, %v116_v45 }
 0x195   :  { %144 = vpush %v118_v49 }
 0x1c4   :  { %s143_s27 = spop %142 }
 0x1c5   :  { %v126_v53 = vstv %s143_s27 }
 0x1c6   :  { %s145_s28 = spop %144 }
 0x1c7   :  { %v124_v52 = vstv %s145_s28 }
 0x1c8   :  { %v125_v54 = vsel %vm123_vm2, %v124_v52, 0.0 }
 0x1c9   :  { %v127_v55 = vsel %vm122_vm3, %v126_v53, %v125_v54 }
 0x1ca   :  { %128 = vst [vmem:[%s224_s2] sm:$0xff] %v127_v55 }
 0x1cb   :  { %133 = vsyncpa [#allocation3], 1 }
 0x1cc   :  { %134 = vsyncpa [#allocation4], 1 }

</bundles_post_ra>
